<compile_context>
chip_gen: v7x
topology: tpu7x:2x2x1
jax: 0.10.0
libtpu: 0.0.40
codegen_flags: <defaults>
</compile_context>

<pallas_src>
import jax
import jax.numpy as jnp
from jax import lax
from jax.experimental import pallas as pl
from jax.experimental.pallas import tpu as pltpu


def _model_kernel(x1_ref, x2_ref, w1_ref, b1_ref, w2_ref, b2_ref, out_ref):
    N = x1_ref.shape[0]

    # fc: Linear(128,256) -> ReLU -> Linear(256,128)
    # Weights arrive as bf16; activations cast to bf16 at the dot, f32 accum.
    # Elementwise work (bias add, ReLU) stays f32 (v5e VPU has no bf16 path).
    h = jnp.dot(
        x2_ref[...].astype(jnp.bfloat16),
        w1_ref[...],
        preferred_element_type=jnp.float32,
    )
    h = jnp.maximum(h + b1_ref[...], 0.0)
    v1 = jnp.dot(
        h.astype(jnp.bfloat16),
        w2_ref[...],
        preferred_element_type=jnp.float32,
    ) + b2_ref[...]

    # v2 = x1 + v1 @ v1.T  -- contract dim 1 of both operands so no explicit
    # transpose is materialized.  Kept f32 on purpose: this product amplifies
    # rounding and the FLOP cost at N=128 is negligible vs. the launch floor.
    gram = lax.dot_general(
        v1, v1,
        dimension_numbers=(((1,), (1,)), ((), ())),
        preferred_element_type=jnp.float32,
    )
    v2 = x1_ref[...] + gram

    # cat([v2, x1, zeros_like(x1)], dim=1) -- all three slabs written here,
    # lane-aligned (each N = 128 wide), so no masked stores and no wrapper op.
    out_ref[:, :N] = v2.astype(out_ref.dtype)
    out_ref[:, N:2 * N] = x1_ref[...].astype(out_ref.dtype)
    out_ref[:, 2 * N:] = jnp.zeros((N, N), out_ref.dtype)


def _model_forward_impl(x1, x2, w1, b1, w2, b2):
    N = x1.shape[0]
    D_in = x2.shape[1]
    D_hid = w1.shape[1]
    D_out = w2.shape[1]

    flops = 2 * N * D_in * D_hid + 2 * N * D_hid * D_out + 2 * N * D_out * N
    bytes_accessed = (
        x1.size * x1.dtype.itemsize
        + x2.size * x2.dtype.itemsize
        + w1.size * w1.dtype.itemsize      # bf16 weights counted at 2 B
        + b1.size * b1.dtype.itemsize
        + w2.size * w2.dtype.itemsize
        + b2.size * b2.dtype.itemsize
        + N * 3 * N * 4                    # full (N, 3N) f32 output
    )

    return pl.pallas_call(
        _model_kernel,
        out_shape=jax.ShapeDtypeStruct((N, 3 * N), jnp.float32),
        in_specs=[
            pl.BlockSpec(memory_space=pltpu.MemorySpace.VMEM),  # x1
            pl.BlockSpec(memory_space=pltpu.MemorySpace.VMEM),  # x2
            pl.BlockSpec(memory_space=pltpu.MemorySpace.VMEM),  # w1 (bf16)
            pl.BlockSpec(memory_space=pltpu.MemorySpace.VMEM),  # b1
            pl.BlockSpec(memory_space=pltpu.MemorySpace.VMEM),  # w2 (bf16)
            pl.BlockSpec(memory_space=pltpu.MemorySpace.VMEM),  # b2
        ],
        out_specs=pl.BlockSpec(memory_space=pltpu.MemorySpace.VMEM),
        cost_estimate=pl.CostEstimate(
            flops=flops, transcendentals=0, bytes_accessed=bytes_accessed
        ),
    )(x1, x2, w1, b1, w2, b2)


model_forward = jax.jit(_model_forward_impl)


def _reference_f32(x1, x2, w1, b1, w2, b2):
    # Pure-f32 reference (torch-style forward).
    h = jnp.maximum(x2 @ w1 + b1, 0.0)
    v1 = h @ w2 + b2
    v2 = x1 + jnp.dot(v1, v1.T, preferred_element_type=jnp.float32)
    return jnp.concatenate([v2, x1, jnp.zeros_like(x1)], axis=1)


def _reference_matched(x1, x2, w1_bf16, b1, w2_bf16, b2):
    # Same precision recipe as the kernel: bf16 weights + bf16 activation
    # operands, f32 accumulation, f32 Gram.
    bf = jnp.bfloat16
    h = jnp.dot(x2.astype(bf), w1_bf16, preferred_element_type=jnp.float32)
    h = jnp.maximum(h + b1, 0.0)
    v1 = jnp.dot(h.astype(bf), w2_bf16, preferred_element_type=jnp.float32) + b2
    v2 = x1 + jnp.dot(v1, v1.T, preferred_element_type=jnp.float32)
    return jnp.concatenate([v2, x1, jnp.zeros_like(x1)], axis=1)


if __name__ == "__main__":
    key = jax.random.PRNGKey(0)
    k_x1, k_x2, k_w1, k_b1, k_w2, k_b2 = jax.random.split(key, 6)

    N = 128                      # addmm(x1, v1, v1.T) forces x1 to be (N, N)
    D_IN, D_HID, D_OUT = 128, 256, 128

    x1 = jax.random.normal(k_x1, (N, N), dtype=jnp.float32)
    x2 = jax.random.normal(k_x2, (N, D_IN), dtype=jnp.float32)

    # PyTorch-Linear-style uniform init, stored pre-transposed (x @ W layout).
    bound1 = 1.0 / (D_IN ** 0.5)
    w1 = jax.random.uniform(k_w1, (D_IN, D_HID), jnp.float32, -bound1, bound1)
    b1 = jax.random.uniform(k_b1, (1, D_HID), jnp.float32, -bound1, bound1)
    bound2 = 1.0 / (D_HID ** 0.5)
    w2 = jax.random.uniform(k_w2, (D_HID, D_OUT), jnp.float32, -bound2, bound2)
    b2 = jax.random.uniform(k_b2, (1, D_OUT), jnp.float32, -bound2, bound2)

    # Weights are pre-cast to bf16 ONCE outside jit (half the weight DMA).
    w1_bf = w1.astype(jnp.bfloat16)
    w2_bf = w2.astype(jnp.bfloat16)

    out = model_forward(x1, x2, w1_bf, b1, w2_bf, b2)
    out = jax.block_until_ready(out)
    assert out.shape == (N, 3 * N), out.shape

    # Tight check vs. a reference using the identical precision recipe
    # (same bf16 weights, bf16 activation operands, f32 accumulation).
    ref_m = _reference_matched(x1, x2, w1_bf, b1, w2_bf, b2)
    assert jnp.allclose(out, ref_m, atol=5e-3, rtol=5e-3), (
        "mismatch vs matched-precision reference: "
        f"max abs err {float(jnp.max(jnp.abs(out - ref_m)))}"
    )

    # Looser check vs. the pure-f32 reference (bf16 weights/MXU operands in MLP).
    ref_f = _reference_f32(x1, x2, w1, b1, w2, b2)
    assert jnp.allclose(out, ref_f, atol=5e-2, rtol=5e-2), (
        "mismatch vs f32 reference: "
        f"max abs err {float(jnp.max(jnp.abs(out - ref_f)))}"
    )

    print("KERNEL_OK")
</pallas_src>

<mosaic_0001>
module attributes {stable_mosaic.version = 11 : i64} {
  func.func @_model_kernel(%arg0: memref<128x128xf32, #tpu.memory_space<vmem>>, %arg1: memref<128x128xf32, #tpu.memory_space<vmem>>, %arg2: memref<128x256xbf16, #tpu.memory_space<vmem>>, %arg3: memref<1x256xf32, #tpu.memory_space<vmem>>, %arg4: memref<256x128xbf16, #tpu.memory_space<vmem>>, %arg5: memref<1x128xf32, #tpu.memory_space<vmem>>, %arg6: memref<128x384xf32, #tpu.memory_space<vmem>>) attributes {dimension_semantics = [], scalar_prefetch = 0 : i64, scratch_operands = 0 : i64, tpu.core_type = #tpu.core_type<tc>} {
    %c0 = arith.constant 0 : index
    %c0_0 = arith.constant 0 : index
    %0 = vector.load %arg1[%c0, %c0_0] : memref<128x128xf32, #tpu.memory_space<vmem>>, vector<128x128xf32>
    %1 = arith.truncf %0 : vector<128x128xf32> to vector<128x128xbf16>
    %c0_1 = arith.constant 0 : index
    %c0_2 = arith.constant 0 : index
    %2 = vector.load %arg2[%c0_1, %c0_2] : memref<128x256xbf16, #tpu.memory_space<vmem>>, vector<128x256xbf16>
    %cst = arith.constant dense<0.000000e+00> : vector<128x256xf32>
    %3 = tpu.matmul %1, %2, %cst {dimension_numbers = #tpu.dot_dimension_numbers<[1], [0], [0], [1], [0, 0, 1, 1], [], []>} : vector<128x128xbf16>, vector<128x256xbf16>, vector<128x256xf32> -> vector<128x256xf32>
    %c0_3 = arith.constant 0 : index
    %c0_4 = arith.constant 0 : index
    %4 = vector.load %arg3[%c0_3, %c0_4] : memref<1x256xf32, #tpu.memory_space<vmem>>, vector<1x256xf32>
    %5 = vector.broadcast %4 : vector<1x256xf32> to vector<128x256xf32>
    %6 = arith.addf %3, %5 : vector<128x256xf32>
    %cst_5 = arith.constant 0.000000e+00 : f32
    %7 = vector.broadcast %cst_5 : f32 to vector<128x256xf32>
    %8 = arith.maximumf %6, %7 : vector<128x256xf32>
    %9 = arith.truncf %8 : vector<128x256xf32> to vector<128x256xbf16>
    %c0_6 = arith.constant 0 : index
    %c0_7 = arith.constant 0 : index
    %10 = vector.load %arg4[%c0_6, %c0_7] : memref<256x128xbf16, #tpu.memory_space<vmem>>, vector<256x128xbf16>
    %cst_8 = arith.constant dense<0.000000e+00> : vector<128x128xf32>
    %11 = tpu.matmul %9, %10, %cst_8 {dimension_numbers = #tpu.dot_dimension_numbers<[1], [0], [0], [1], [0, 0, 1, 1], [], []>} : vector<128x256xbf16>, vector<256x128xbf16>, vector<128x128xf32> -> vector<128x128xf32>
    %c0_9 = arith.constant 0 : index
    %c0_10 = arith.constant 0 : index
    %12 = vector.load %arg5[%c0_9, %c0_10] : memref<1x128xf32, #tpu.memory_space<vmem>>, vector<1x128xf32>
    %13 = vector.broadcast %12 : vector<1x128xf32> to vector<128x128xf32>
    %14 = arith.addf %11, %13 : vector<128x128xf32>
    %cst_11 = arith.constant dense<0.000000e+00> : vector<128x128xf32>
    %15 = tpu.matmul %14, %14, %cst_11 {dimension_numbers = #tpu.dot_dimension_numbers<[1], [1], [0], [0], [0, 0, 1, 0], [], []>} : vector<128x128xf32>, vector<128x128xf32>, vector<128x128xf32> -> vector<128x128xf32>
    %c0_12 = arith.constant 0 : index
    %c0_13 = arith.constant 0 : index
    %16 = vector.load %arg0[%c0_12, %c0_13] : memref<128x128xf32, #tpu.memory_space<vmem>>, vector<128x128xf32>
    %17 = arith.addf %16, %15 : vector<128x128xf32>
    %c0_14 = arith.constant 0 : index
    %c0_15 = arith.constant 0 : index
    %18 = vector.load %arg6[%c0_14, %c0_15] : memref<128x384xf32, #tpu.memory_space<vmem>>, vector<128x128xf32>
    tpu.vector_store %arg6[%c0_14, %c0_15], %17 {strides = array<i32>} : memref<128x384xf32, #tpu.memory_space<vmem>>, vector<128x128xf32>,
    %c0_16 = arith.constant 0 : index
    %c0_17 = arith.constant 0 : index
    %19 = vector.load %arg0[%c0_16, %c0_17] : memref<128x128xf32, #tpu.memory_space<vmem>>, vector<128x128xf32>
    %c0_18 = arith.constant 0 : index
    %c128 = arith.constant 128 : index
    %20 = vector.load %arg6[%c0_18, %c128] : memref<128x384xf32, #tpu.memory_space<vmem>>, vector<128x128xf32>
    tpu.vector_store %arg6[%c0_18, %c128], %19 {strides = array<i32>} : memref<128x384xf32, #tpu.memory_space<vmem>>, vector<128x128xf32>,
    %cst_19 = arith.constant 0.000000e+00 : f32
    %21 = vector.broadcast %cst_19 : f32 to vector<128x128xf32>
    %c0_20 = arith.constant 0 : index
    %c256 = arith.constant 256 : index
    %22 = vector.load %arg6[%c0_20, %c256] : memref<128x384xf32, #tpu.memory_space<vmem>>, vector<128x128xf32>
    tpu.vector_store %arg6[%c0_20, %c256], %21 {strides = array<i32>} : memref<128x384xf32, #tpu.memory_space<vmem>>, vector<128x128xf32>,
    return
  }
}

</mosaic_0001>

<bundles_post_ra>
// kernel: _model_forward_impl.1
= control target key start
LH: loop header
LB: loop body
LE: loop exit
PB: predicated region body
PF: predicated region fallthrough
CT: control target
= control target key end

     0   :  { %11 = vsyncpa [#allocation3], 0  ;;  %s1512_s0 = inlined_call_operand.hbm [shape: f32[128,128], index: 0, kind: input, shape index: {}]   ;;  %s1513_s1 = inlined_call_operand.hbm [shape: f32[128,128], index: 1, kind: input, shape index: {}]   ;;  %s1514_s2 = inlined_call_operand.hbm [shape: bf16[128,256], index: 2, kind: input, shape index: {}]   ;;  %s1515_s3 = inlined_call_operand.vmem [shape: f32[1,256], index: 3, kind: input, shape index: {}]   ;;  %s1516_s4 = inlined_call_operand.hbm [shape: bf16[256,128], index: 4, kind: input, shape index: {}]   ;;  %s1517_s5 = inlined_call_operand.vmem [shape: f32[1,128], index: 5, kind: input, shape index: {}]   ;;  %s1518_s6 = inlined_call_operand.hbm [shape: f32[128,384], index: 6, kind: output, shape index: {}]  }
   0x1   :  { %12 = vsyncpa [#allocation6], 0 }
   0x2   :  { %13 = vsyncpa [#allocation9], 0 }
   0x3   :  { %14 = vsyncpa [#allocation4], 0  ;;  %s1269_s21 = smov [#allocation5]   ;;  %s1270_s23 = smov [#allocation2]  }
   0x4   :  { %s32_s22 = sshll.u32 %s1269_s21, 4  ;;  %s20_s24 = sshll.u32 %s1270_s23, 4  ;;  %s33_s22 = int_to_ptr.vmem [resolvable:$true] %s32_s22  ;;  %s1317_s24 = int_to_ptr.vmem [resolvable:$true] %s20_s24 }
   0x5   :  { %s1151_s27 = scalar_lea.hbm %s1513_s1, 2048 }
   0x6   :  { %p1152_p0 = scmp.ne.s32.totalorder %s1513_s1, %s1151_s27  ;;  %p1155_p1 = scmp.lt.u32.totalorder %s1151_s27, %s1513_s1 }
   0x8   :  { %p1157_p2 = pnand %p1155_p1, %p1152_p0 }
   0xa   :  { %1160 = shalt.err (!%p1157_p2)
}
   0xb   :  { %s1161_s8 = scalar_lea.vmem %s33_s22, 2048  ;;  %p1166_p4 = scmp.lt.s32.totalorder %s33_s22, %s33_s22 }
   0xc   :  { %p1162_p3 = scmp.ne.s32.totalorder %s33_s22, %s1161_s8  ;;  %p1167_p5 = scmp.lt.s32.totalorder %s1161_s8, %s1161_s8 }
   0xe   :  { %p1168_p6 = por %p1167_p5, %p1166_p4 }
  0x10   :  { %p1169_p7 = pnand %p1168_p6, %p1162_p3 }
  0x12   :  { %1172 = shalt.err (!%p1169_p7)
}
  0x13   :  { %s1271_s9 = smov 128   ;;  %s1272_s10 = smov 8  }
  0x14   :  { %38 = dma.hbm_to_vmem [thread:$0]  %s1513_s1, 2048, %s33_s22, [#allocation6], %s1271_s9, %s1271_s9, %s1272_s10  }
  0x15   :  { %s1173_s15 = scalar_lea.hbm %s1512_s0, 2048 }
  0x16   :  { %p1174_p8 = scmp.ne.s32.totalorder %s1512_s0, %s1173_s15  ;;  %p1177_p9 = scmp.lt.u32.totalorder %s1173_s15, %s1512_s0 }
  0x18   :  { %p1179_p10 = pnand %p1177_p9, %p1174_p8 }
  0x1a   :  { %1182 = shalt.err (!%p1179_p10)
}
  0x1b   :  { %s1183_s20 = scalar_lea.vmem %s1317_s24, 2048  ;;  %p1188_p12 = scmp.lt.s32.totalorder %s1317_s24, %s1317_s24 }
  0x1c   :  { %p1184_p11 = scmp.ne.s32.totalorder %s1317_s24, %s1183_s20  ;;  %p1189_p13 = scmp.lt.s32.totalorder %s1183_s20, %s1183_s20 }
  0x1e   :  { %p1190_p0 = por %p1189_p13, %p1188_p12 }
  0x20   :  { %p1191_p1 = pnand %p1190_p0, %p1184_p11 }
  0x22   :  { %1194 = shalt.err (!%p1191_p1)
}
  0x23   :  { %26 = dma.hbm_to_vmem [thread:$0]  %s1512_s0, 2048, %s1317_s24, [#allocation3], %s1271_s9, %s1271_s9, %s1272_s10  }
  0x24   :  { %s1273_s22 = smov [#allocation7]   ;;  %s1274_s25 = smov [#allocation8]  }
  0x25   :  { %s44_s23 = sshll.u32 %s1273_s22, 4  ;;  %s58_s26 = sshll.u32 %s1274_s25, 4  ;;  %s45_s23 = int_to_ptr.vmem [resolvable:$true] %s44_s23  ;;  %s1354_s26 = int_to_ptr.vmem [resolvable:$true] %s58_s26 }
  0x26   :  { %s1195_s29 = scalar_lea.hbm %s1514_s2, 2048 }
  0x27   :  { %p1196_p2 = scmp.ne.s32.totalorder %s1514_s2, %s1195_s29  ;;  %p1199_p3 = scmp.lt.u32.totalorder %s1195_s29, %s1514_s2 }
  0x29   :  { %p1201_p4 = pnand %p1199_p3, %p1196_p2 }
  0x2b   :  { %1204 = shalt.err (!%p1201_p4)
}
  0x2c   :  { %s1205_s0 = scalar_lea.vmem %s45_s23, 2048  ;;  %p1210_p6 = scmp.lt.s32.totalorder %s45_s23, %s45_s23 }
  0x2d   :  { %p1206_p5 = scmp.ne.s32.totalorder %s45_s23, %s1205_s0  ;;  %p1211_p7 = scmp.lt.s32.totalorder %s1205_s0, %s1205_s0 }
  0x2f   :  { %p1212_p8 = por %p1211_p7, %p1210_p6 }
  0x31   :  { %p1213_p9 = pnand %p1212_p8, %p1206_p5 }
  0x33   :  { %1216 = shalt.err (!%p1213_p9)
}
  0x34   :  { %50 = dma.hbm_to_vmem [thread:$0]  %s1514_s2, 2048, %s45_s23, [#allocation6], %s1271_s9, %s1271_s9, %s1272_s10  }
  0x35   :  { %s1217_s15 = scalar_lea.hbm %s1516_s4, 2048 }
  0x36   :  { %p1218_p10 = scmp.ne.s32.totalorder %s1516_s4, %s1217_s15  ;;  %p1221_p11 = scmp.lt.u32.totalorder %s1217_s15, %s1516_s4 }
  0x38   :  { %p1223_p12 = pnand %p1221_p11, %p1218_p10 }
  0x3a   :  { %1226 = shalt.err (!%p1223_p12)
}
  0x3b   :  { %s1227_s20 = scalar_lea.vmem %s1354_s26, 2048  ;;  %p1232_p0 = scmp.lt.s32.totalorder %s1354_s26, %s1354_s26 }
  0x3c   :  { %p1228_p13 = scmp.ne.s32.totalorder %s1354_s26, %s1227_s20  ;;  %p1233_p1 = scmp.lt.s32.totalorder %s1227_s20, %s1227_s20 }
  0x3e   :  { %p1234_p2 = por %p1233_p1, %p1232_p0 }
  0x40   :  { %p1235_p3 = pnand %p1234_p2, %p1228_p13 }
  0x42   :  { %1238 = shalt.err (!%p1235_p3)
}
  0x43   :  { %s1275_s2 = smov 64   ;;  %s1276_s9 = smov 4  }
  0x44   :  { %64 = dma.hbm_to_vmem [thread:$0]  %s1516_s4, 2048, %s1354_s26, [#allocation9], %s1275_s2, %s1275_s2, %s1276_s9  }
  0x45   :  { %1261 = dma.done.wait [#allocation3], 2048  }
  0x46   :  { %1262 = vsyncadd [#allocation3], 4294965248 }
  0x47   :  { %1263 = dma.done.wait [#allocation6], 4096  }
  0x48   :  { %1264 = vsyncadd [#allocation6], 4294963200 }
  0x49   :  { %1265 = dma.done.wait [#allocation9], 2048  }
  0x4a   :  { %1266 = vsyncadd [#allocation9], 4294965248  ;;  %v1277_v0 = vmov 0   ;;  %v1111_v1 = vld [vmem:[#allocation7 + $0x4] ss:$8 sps:$4 sm:$0xff]   ;;  %v1139_v18 = vld [vmem:[#allocation8 + $0x50] sm:$0xff]   ;;  %v122_v57 = vlaneseq }
  0x4b   :  { %244 = vmatprep.mubr.bf16.mxu0 %v1277_v0  ;;  %v1113_v2 = vld [vmem:[#allocation7] ss:$8 sps:$4 sm:$0xff]   ;;  %212 = vmatprep.subr.bf16.mxu0 %v1111_v1  ;;  %v1114_v3 = vld [vmem:[#allocation7 + $0x14] ss:$8 sps:$4 sm:$0xff]   ;;  %v1116_v4 = vld [vmem:[#allocation7 + $0x10] ss:$8 sps:$4 sm:$0xff]  }
  0x4c   :  { %213 = vmatpush1.bf16.msra.mxu0 %v1113_v2  ;;  %v1117_v5 = vld [vmem:[#allocation7 + $0x24] ss:$8 sps:$4 sm:$0xff]   ;;  %v1119_v6 = vld [vmem:[#allocation7 + $0x20] ss:$8 sps:$4 sm:$0xff]   ;;  %v1120_v7 = vld [vmem:[#allocation7 + $0x34] ss:$8 sps:$4 sm:$0xff]  }
  0x4d   :  { %214 = vmatprep.subr.bf16.mxu0 %v1114_v3  ;;  %v1122_v8 = vld [vmem:[#allocation7 + $0x30] ss:$8 sps:$4 sm:$0xff]   ;;  %v1123_v9 = vld [vmem:[#allocation7 + $0x44] ss:$8 sps:$4 sm:$0xff]   ;;  %v1125_v10 = vld [vmem:[#allocation7 + $0x40] ss:$8 sps:$4 sm:$0xff]  }
  0x4e   :  { %v1126_v11 = vld [vmem:[#allocation7 + $0x54] ss:$8 sps:$4 sm:$0xff]   ;;  %v1135_v12 = vld [vmem:[#allocation8 + $0x40] sm:$0xff]   ;;  %v1128_v13 = vld [vmem:[#allocation7 + $0x50] ss:$8 sps:$4 sm:$0xff]   ;;  %v123_v58 = vshrl.u32 %v122_v57, 7 }
  0x4f   :  { %v1136_v14 = vld [vmem:[#allocation8] sm:$0xff]   ;;  %898 = vmatprep.subr.bf16.mxu1 %v1135_v12  ;;  %v1137_v16 = vld [vmem:[#allocation8 + $0x48] sm:$0xff]   ;;  %v1132_v20 = vld [vmem:[#allocation7 + $0x74] ss:$8 sps:$4 sm:$0xff]  }
  0x50   :  { %215 = vmatpush1.bf16.msra.mxu0 %v1116_v4  ;;  %v1129_v15 = vld [vmem:[#allocation7 + $0x64] ss:$8 sps:$4 sm:$0xff]   ;;  %899 = vmatpush3.bf16.msra.mxu1 %v1136_v14  ;;  %v1131_v19 = vld [vmem:[#allocation7 + $0x60] ss:$8 sps:$4 sm:$0xff]   ;;  %v1140_v21 = vld [vmem:[#allocation8 + $0x10] sm:$0xff]   ;;  %v124_v59 = vsub.s32 0, %v123_v58 }
  0x51   :  { %216 = vmatprep.subr.bf16.mxu0 %v1117_v5  ;;  %v1138_v17 = vld [vmem:[#allocation8 + $0x8] sm:$0xff]   ;;  %900 = vmatprep.subr.bf16.mxu1 %v1137_v16  ;;  %v1141_v22 = vld [vmem:[#allocation8 + $0x58] sm:$0xff]   ;;  %v80_v24 = vld [vmem:[#allocation5] sm:$0xff]  ;;  %v128_v61 = vsub.s32 1, %v123_v58 }
  0x52   :  { %v1134_v23 = vld [vmem:[#allocation7 + $0x70] ss:$8 sps:$4 sm:$0xff]   ;;  %v81_v25 = vld [vmem:[#allocation5 + $0x8] sm:$0xff]  ;;  %v1143_v27 = vld [vmem:[#allocation8 + $0x60] sm:$0xff]  }
  0x53   :  { %v1142_v26 = vld [vmem:[#allocation8 + $0x18] sm:$0xff]   ;;  %v96_v28 = vpack.c.bf16 %v81_v25, %v80_v24  ;;  %v1144_v29 = vld [vmem:[#allocation8 + $0x20] sm:$0xff]   ;;  %v1145_v30 = vld [vmem:[#allocation8 + $0x68] sm:$0xff]  }
  0x54   :  { %217 = vmatpush1.bf16.msra.mxu0 %v1119_v6  ;;  %901 = vmatpush3.bf16.msra.mxu1 %v1138_v17  ;;  %v82_v31 = vld [vmem:[#allocation5 + $0x10] sm:$0xff]  ;;  %v83_v32 = vld [vmem:[#allocation5 + $0x18] sm:$0xff]  ;;  %v84_v34 = vld [vmem:[#allocation5 + $0x20] sm:$0xff] }
  0x55   :  { %218 = vmatprep.subr.bf16.mxu0 %v1120_v7  ;;  %902 = vmatprep.subr.bf16.mxu1 %v1139_v18  ;;  %v97_v33 = vpack.c.bf16 %v83_v32, %v82_v31  ;;  %v85_v35 = vld [vmem:[#allocation5 + $0x28] sm:$0xff]  ;;  %v86_v37 = vld [vmem:[#allocation5 + $0x30] sm:$0xff]  ;;  %v87_v38 = vld [vmem:[#allocation5 + $0x38] sm:$0xff] }
  0x56   :  { %v98_v36 = vpack.c.bf16 %v85_v35, %v84_v34  ;;  %v99_v39 = vpack.c.bf16 %v87_v38, %v86_v37  ;;  %v88_v40 = vld [vmem:[#allocation5 + $0x40] sm:$0xff]  ;;  %v89_v41 = vld [vmem:[#allocation5 + $0x48] sm:$0xff]  ;;  %v90_v43 = vld [vmem:[#allocation5 + $0x50] sm:$0xff] }
  0x57   :  { %v100_v42 = vpack.c.bf16 %v89_v41, %v88_v40  ;;  %v91_v44 = vld [vmem:[#allocation5 + $0x58] sm:$0xff]  ;;  %v92_v46 = vld [vmem:[#allocation5 + $0x60] sm:$0xff]  ;;  %v93_v47 = vld [vmem:[#allocation5 + $0x68] sm:$0xff] }
  0x58   :  { %219 = vmatpush1.bf16.msra.mxu0 %v1122_v8  ;;  %903 = vmatpush3.bf16.msra.mxu1 %v1140_v21  ;;  %v101_v45 = vpack.c.bf16 %v91_v44, %v90_v43  ;;  %v102_v48 = vpack.c.bf16 %v93_v47, %v92_v46  ;;  %v94_v49 = vld [vmem:[#allocation5 + $0x70] sm:$0xff]  ;;  %v95_v50 = vld [vmem:[#allocation5 + $0x78] sm:$0xff]  ;;  %v1146_v52 = vld [vmem:[#allocation8 + $0x28] sm:$0xff]  }
  0x59   :  { %220 = vmatprep.subr.bf16.mxu0 %v1123_v9  ;;  %904 = vmatprep.subr.bf16.mxu1 %v1141_v22  ;;  %v103_v51 = vpack.c.bf16 %v95_v50, %v94_v49  ;;  %v1147_v53 = vld [vmem:[#allocation8 + $0x70] sm:$0xff]   ;;  %v1149_v55 = vld [vmem:[#allocation8 + $0x78] sm:$0xff]   ;;  %v120_v60 = vld [vmem:[%s1515_s3] sm:$0x3] }
  0x5a   :  { %v1148_v54 = vld [vmem:[#allocation8 + $0x30] sm:$0xff]   ;;  %v1150_v56 = vld [vmem:[#allocation8 + $0x38] sm:$0xff]   ;;  %v1399_v62 = vrot.slane %v120_v60, %v124_v59  ;;  %v1401_v63 = vrot.slane %v120_v60, %v128_v61 }
  0x5c   :  { %221 = vmatpush1.bf16.msra.mxu0 %v1125_v10  ;;  %905 = vmatpush3.bf16.msra.mxu1 %v1142_v26 }
  0x5d   :  { %222 = vmatprep.subr.bf16.mxu0 %v1126_v11  ;;  %906 = vmatprep.subr.bf16.mxu1 %v1143_v27 }
  0x60   :  { %223 = vmatpush1.bf16.msra.mxu0 %v1128_v13  ;;  %907 = vmatpush3.bf16.msra.mxu1 %v1144_v29 }
  0x61   :  { %224 = vmatprep.subr.bf16.mxu0 %v1129_v15  ;;  %908 = vmatprep.subr.bf16.mxu1 %v1145_v30 }
  0x64   :  { %225 = vmatpush1.bf16.msra.mxu0 %v1131_v19  ;;  %909 = vmatpush3.bf16.msra.mxu1 %v1146_v52 }
  0x65   :  { %226 = vmatprep.subr.bf16.mxu0 %v1132_v20  ;;  %910 = vmatprep.subr.bf16.mxu1 %v1147_v53 }
  0x68   :  { %227 = vmatpush1.bf16.msra.mxu0 %v1134_v23  ;;  %911 = vmatpush3.bf16.msra.mxu1 %v1148_v54 }
  0x69   :  { %912 = vmatprep.subr.bf16.mxu1 %v1149_v55 }
  0x6b   :  { %245 = vmatmul.mubr.bf16.vlgmr.msra.gmra.mrb[0].mxu0 %v96_v28 }
  0x6c   :  { %254 = vmatprep.mubr.bf16.mxu0 %v1277_v0  ;;  %913 = vmatpush3.bf16.msra.mxu1 %v1150_v56 }
  0x73   :  { %255 = vmatmul.mubr.bf16.gmra.mrb[4].mxu0 %v97_v33 }
  0x74   :  { %264 = vmatprep.mubr.bf16.mxu0 %v1277_v0 }
  0x7b   :  { %265 = vmatmul.mubr.bf16.gmra.mrb[8].mxu0 %v98_v36 }
  0x7c   :  { %274 = vmatprep.mubr.bf16.mxu0 %v1277_v0 }
  0x83   :  { %275 = vmatmul.mubr.bf16.gmra.mrb[12].mxu0 %v99_v39 }
  0x84   :  { %284 = vmatprep.mubr.bf16.mxu0 %v1277_v0 }
  0x8b   :  { %285 = vmatmul.mubr.bf16.gmra.mrb[16].mxu0 %v100_v42 }
  0x8c   :  { %294 = vmatprep.mubr.bf16.mxu0 %v1277_v0 }
  0x93   :  { %295 = vmatmul.mubr.bf16.gmra.mrb[20].mxu0 %v101_v45 }
  0x94   :  { %304 = vmatprep.mubr.bf16.mxu0 %v1277_v0 }
  0x9b   :  { %305 = vmatmul.mubr.bf16.gmra.mrb[24].mxu0 %v102_v48 }
  0x9c   :  { %314 = vmatprep.mubr.bf16.mxu0 %v1277_v0 }
  0xa3   :  { %315 = vmatmul.mubr.bf16.gmra.mrb[28].mxu0 %v103_v51 }
 0x13e   :  { %v246_v0 = vpop.f32.mrb[0].mxu0 }
 0x13f   :  { %v247_v1 = vadd.f32 %v246_v0, %v1399_v62  ;;  %v248_v2 = vpop.f32.mrb[1].mxu0 }
 0x140   :  { %v249_v3 = vadd.f32 %v248_v2, %v1401_v63  ;;  %v250_v4 = vpop.f32.mrb[2].mxu0 }
 0x141   :  { %v251_v5 = vadd.f32 %v250_v4, %v1399_v62  ;;  %v252_v6 = vpop.f32.mrb[3].mxu0  ;;  %v325_v8 = vmax.f32 %v247_v1, 0.0 }
 0x142   :  { %v253_v7 = vadd.f32 %v252_v6, %v1401_v63  ;;  %v326_v10 = vmax.f32 %v249_v3, 0.0 }
 0x143   :  { %v327_v9 = vmax.f32 %v251_v5, 0.0 }
 0x144   :  { %v328_v11 = vmax.f32 %v253_v7, 0.0 }
 0x145   :  { %v357_v12 = vpack.c.bf16 %v327_v9, %v325_v8 }
 0x146   :  { %v256_v13 = vpop.f32.mrb[4].mxu0  ;;  %v358_v14 = vpack.c.bf16 %v328_v11, %v326_v10 }
 0x147   :  { %v257_v15 = vadd.f32 %v256_v13, %v1399_v62  ;;  %v258_v16 = vpop.f32.mrb[5].mxu0 }
 0x148   :  { %v259_v17 = vadd.f32 %v258_v16, %v1401_v63  ;;  %v260_v18 = vpop.f32.mrb[6].mxu0  ;;  %540 = vmatprep.mubr.bf16.mxu1 %v358_v14 }
 0x149   :  { %v261_v19 = vadd.f32 %v260_v18, %v1399_v62  ;;  %v262_v20 = vpop.f32.mrb[7].mxu0  ;;  %541 = vmatmul.mubr.bf16.vlgmr.msra.gmra.mrb[0].mxu1 %v357_v12  ;;  %v329_v22 = vmax.f32 %v257_v15, 0.0 }
 0x14a   :  { %v263_v21 = vadd.f32 %v262_v20, %v1401_v63  ;;  %v330_v24 = vmax.f32 %v259_v17, 0.0 }
 0x14b   :  { %v331_v23 = vmax.f32 %v261_v19, 0.0 }
 0x14c   :  { %v332_v25 = vmax.f32 %v263_v21, 0.0 }
 0x14d   :  { %v359_v26 = vpack.c.bf16 %v331_v23, %v329_v22 }
 0x14e   :  { %v360_v27 = vpack.c.bf16 %v332_v25, %v330_v24  ;;  %v266_v28 = vpop.f32.mrb[8].mxu0 }
 0x14f   :  { %v267_v29 = vadd.f32 %v266_v28, %v1399_v62  ;;  %v268_v30 = vpop.f32.mrb[9].mxu0 }
 0x150   :  { %v269_v31 = vadd.f32 %v268_v30, %v1401_v63  ;;  %v270_v32 = vpop.f32.mrb[10].mxu0  ;;  %548 = vmatprep.mubr.bf16.mxu1 %v360_v27 }
 0x151   :  { %v271_v33 = vadd.f32 %v270_v32, %v1399_v62  ;;  %v272_v34 = vpop.f32.mrb[11].mxu0  ;;  %549 = vmatmul.mubr.bf16.gmra.mrb[4].mxu1 %v359_v26  ;;  %v333_v36 = vmax.f32 %v267_v29, 0.0 }
 0x152   :  { %v273_v35 = vadd.f32 %v272_v34, %v1401_v63  ;;  %v334_v38 = vmax.f32 %v269_v31, 0.0 }
 0x153   :  { %v335_v37 = vmax.f32 %v271_v33, 0.0 }
 0x154   :  { %v336_v39 = vmax.f32 %v273_v35, 0.0 }
 0x155   :  { %v361_v40 = vpack.c.bf16 %v335_v37, %v333_v36 }
 0x156   :  { %v362_v41 = vpack.c.bf16 %v336_v39, %v334_v38  ;;  %v276_v42 = vpop.f32.mrb[12].mxu0 }
 0x157   :  { %v277_v43 = vadd.f32 %v276_v42, %v1399_v62  ;;  %v278_v44 = vpop.f32.mrb[13].mxu0 }
 0x158   :  { %v279_v45 = vadd.f32 %v278_v44, %v1401_v63  ;;  %v280_v46 = vpop.f32.mrb[14].mxu0  ;;  %556 = vmatprep.mubr.bf16.mxu1 %v362_v41 }
 0x159   :  { %v281_v47 = vadd.f32 %v280_v46, %v1399_v62  ;;  %v282_v48 = vpop.f32.mrb[15].mxu0  ;;  %557 = vmatmul.mubr.bf16.gmra.mrb[8].mxu1 %v361_v40  ;;  %v337_v50 = vmax.f32 %v277_v43, 0.0 }
 0x15a   :  { %v283_v49 = vadd.f32 %v282_v48, %v1401_v63  ;;  %v338_v52 = vmax.f32 %v279_v45, 0.0 }
 0x15b   :  { %v339_v51 = vmax.f32 %v281_v47, 0.0 }
 0x15c   :  { %v340_v53 = vmax.f32 %v283_v49, 0.0 }
 0x15d   :  { %v363_v54 = vpack.c.bf16 %v339_v51, %v337_v50  ;;  %v1438_v51 = vld [vmem:[%s1517_s5] ss:$0 sm:$0xff]  ;;  %s1279_s5 = smov [#allocation10]  }
 0x15e   :  { %v364_v55 = vpack.c.bf16 %v340_v53, %v338_v52  ;;  %v286_v56 = vpop.f32.mrb[16].mxu0  ;;  %s851_s23 = sshll.u32 %s1279_s5, 4  ;;  %s852_s23 = int_to_ptr.vmem [resolvable:$true] %s851_s23 }
 0x15f   :  { %v287_v57 = vadd.f32 %v286_v56, %v1399_v62  ;;  %v288_v58 = vpop.f32.mrb[17].mxu0  ;;  %s1239_s25 = scalar_lea.vmem %s852_s23, 6144  ;;  %p1244_p5 = scmp.lt.s32.totalorder %s852_s23, %s852_s23 }
 0x160   :  { %v289_v59 = vadd.f32 %v288_v58, %v1401_v63  ;;  %v290_v60 = vpop.f32.mrb[18].mxu0  ;;  %564 = vmatprep.mubr.bf16.mxu1 %v364_v55  ;;  %p1240_p4 = scmp.ne.s32.totalorder %s852_s23, %s1239_s25  ;;  %p1245_p6 = scmp.lt.s32.totalorder %s1239_s25, %s1239_s25 }
 0x161   :  { %v291_v61 = vadd.f32 %v290_v60, %v1399_v62  ;;  %v292_v0 = vpop.f32.mrb[19].mxu0  ;;  %565 = vmatmul.mubr.bf16.gmra.mrb[12].mxu1 %v363_v54  ;;  %v341_v2 = vmax.f32 %v287_v57, 0.0 }
 0x162   :  { %v293_v1 = vadd.f32 %v292_v0, %v1401_v63  ;;  %v342_v4 = vmax.f32 %v289_v59, 0.0  ;;  %p1246_p7 = por %p1245_p6, %p1244_p5 }
 0x163   :  { %v343_v3 = vmax.f32 %v291_v61, 0.0 }
 0x164   :  { %v344_v5 = vmax.f32 %v293_v1, 0.0  ;;  %p1247_p8 = pnand %p1246_p7, %p1240_p4 }
 0x165   :  { %v365_v6 = vpack.c.bf16 %v343_v3, %v341_v2 }
 0x166   :  { %v366_v7 = vpack.c.bf16 %v344_v5, %v342_v4  ;;  %v296_v8 = vpop.f32.mrb[20].mxu0 }
 0x167   :  { %v297_v9 = vadd.f32 %v296_v8, %v1399_v62  ;;  %v298_v10 = vpop.f32.mrb[21].mxu0 }
 0x168   :  { %v299_v11 = vadd.f32 %v298_v10, %v1401_v63  ;;  %v300_v12 = vpop.f32.mrb[22].mxu0  ;;  %572 = vmatprep.mubr.bf16.mxu1 %v366_v7 }
 0x169   :  { %v301_v13 = vadd.f32 %v300_v12, %v1399_v62  ;;  %v302_v14 = vpop.f32.mrb[23].mxu0  ;;  %573 = vmatmul.mubr.bf16.gmra.mrb[16].mxu1 %v365_v6  ;;  %v345_v16 = vmax.f32 %v297_v9, 0.0 }
 0x16a   :  { %v303_v15 = vadd.f32 %v302_v14, %v1401_v63  ;;  %v346_v18 = vmax.f32 %v299_v11, 0.0 }
 0x16b   :  { %v347_v17 = vmax.f32 %v301_v13, 0.0 }
 0x16c   :  { %v348_v19 = vmax.f32 %v303_v15, 0.0 }
 0x16d   :  { %v367_v20 = vpack.c.bf16 %v347_v17, %v345_v16 }
 0x16e   :  { %v368_v21 = vpack.c.bf16 %v348_v19, %v346_v18  ;;  %v306_v22 = vpop.f32.mrb[24].mxu0 }
 0x16f   :  { %v307_v23 = vadd.f32 %v306_v22, %v1399_v62  ;;  %v308_v24 = vpop.f32.mrb[25].mxu0 }
 0x170   :  { %v309_v25 = vadd.f32 %v308_v24, %v1401_v63  ;;  %v310_v26 = vpop.f32.mrb[26].mxu0  ;;  %580 = vmatprep.mubr.bf16.mxu1 %v368_v21 }
 0x171   :  { %v311_v27 = vadd.f32 %v310_v26, %v1399_v62  ;;  %v312_v28 = vpop.f32.mrb[27].mxu0  ;;  %581 = vmatmul.mubr.bf16.gmra.mrb[20].mxu1 %v367_v20  ;;  %v349_v30 = vmax.f32 %v307_v23, 0.0 }
 0x172   :  { %v313_v29 = vadd.f32 %v312_v28, %v1401_v63  ;;  %v350_v32 = vmax.f32 %v309_v25, 0.0 }
 0x173   :  { %v351_v31 = vmax.f32 %v311_v27, 0.0 }
 0x174   :  { %v352_v33 = vmax.f32 %v313_v29, 0.0 }
 0x175   :  { %v369_v34 = vpack.c.bf16 %v351_v31, %v349_v30 }
 0x176   :  { %v370_v35 = vpack.c.bf16 %v352_v33, %v350_v32  ;;  %v316_v36 = vpop.f32.mrb[28].mxu0 }
 0x177   :  { %v317_v37 = vadd.f32 %v316_v36, %v1399_v62  ;;  %v318_v38 = vpop.f32.mrb[29].mxu0 }
 0x178   :  { %v319_v39 = vadd.f32 %v318_v38, %v1401_v63  ;;  %v320_v40 = vpop.f32.mrb[30].mxu0  ;;  %588 = vmatprep.mubr.bf16.mxu1 %v370_v35 }
 0x179   :  { %v321_v41 = vadd.f32 %v320_v40, %v1399_v62  ;;  %v322_v42 = vpop.f32.mrb[31].mxu0  ;;  %589 = vmatmul.mubr.bf16.gmra.mrb[24].mxu1 %v369_v34  ;;  %v353_v44 = vmax.f32 %v317_v37, 0.0 }
 0x17a   :  { %v323_v43 = vadd.f32 %v322_v42, %v1401_v63  ;;  %v354_v46 = vmax.f32 %v319_v39, 0.0 }
 0x17b   :  { %v355_v45 = vmax.f32 %v321_v41, 0.0 }
 0x17c   :  { %v356_v47 = vmax.f32 %v323_v43, 0.0 }
 0x17d   :  { %v371_v48 = vpack.c.bf16 %v355_v45, %v353_v44 }
 0x17e   :  { %v372_v49 = vpack.c.bf16 %v356_v47, %v354_v46 }
 0x180   :  { %596 = vmatprep.mubr.bf16.mxu1 %v372_v49 }
 0x181   :  { %597 = vmatmul.mubr.bf16.gmra.mrb[28].mxu1 %v371_v48 }
 0x21c   :  { %v914_v50 = vpop.f32.mrb[0].mxu1 }
 0x21d   :  { %v915_v52 = vpop.f32.mrb[1].mxu1 }
 0x21e   :  { %v916_v62 = vadd.f32 %v915_v52, %v914_v50  ;;  %v917_v53 = vpop.f32.mrb[2].mxu1 }
 0x21f   :  { %v918_v54 = vpop.f32.mrb[3].mxu1 }
 0x220   :  { %v543_v63 = vadd.f32 %v916_v62, %v1438_v51  ;;  %v919_v55 = vadd.f32 %v918_v54, %v917_v53 }
 0x222   :  { %v1442_v56 = vadd.f32 %v919_v55, %v1438_v51  ;;  %1026 = vmatprep.mubr.f32.mxu0 %v543_v63 }
 0x224   :  { %v1050_v57 = vpack.c.bf16 %v1442_v56, %v543_v63  ;;  %v920_v58 = vpop.f32.mrb[4].mxu1 }
 0x225   :  { %v921_v59 = vpop.f32.mrb[5].mxu1 }
 0x226   :  { %v922_v60 = vadd.f32 %v921_v59, %v920_v58  ;;  %v923_v61 = vpop.f32.mrb[6].mxu1  ;;  %1051 = vmatprep.subr.bf16.mxu0 %v1050_v57  ;;  %1082 = vmatprep.subr.bf16.mxu1 %v1050_v57  ;;  %v750_v59 = vld [vmem:[#allocation2] sm:$0xff] }
 0x227   :  { %v924_v0 = vpop.f32.mrb[7].mxu1  ;;  %1053 = vmatpush3.bf16.xpose.msra.mxu0 %v1050_v57  ;;  %1090 = vmatpush3.bf16.xpose.msra.mxu1 %v1050_v57  ;;  %814 = vst [vmem:[#allocation10 + $0x8] sm:$0xff] %v750_v59 }
 0x228   :  { %v925_v1 = vadd.f32 %v924_v0, %v923_v61  ;;  %v1446_v2 = vadd.f32 %v922_v60, %v1438_v51  ;;  %v758_v60 = vld [vmem:[#allocation2 + $0x40] sm:$0xff]  ;;  %v753_v61 = vld [vmem:[#allocation2 + $0x18] sm:$0xff] }
 0x229   :  { %822 = vst [vmem:[#allocation10 + $0xc8] sm:$0xff] %v758_v60  ;;  %v761_v0 = vld [vmem:[#allocation2 + $0x58] sm:$0xff]  ;;  %817 = vst [vmem:[#allocation10 + $0x50] sm:$0xff] %v753_v61 }
 0x22a   :  { %v1449_v3 = vadd.f32 %v925_v1, %v1438_v51  ;;  %v752_v1 = vld [vmem:[#allocation2 + $0x10] sm:$0xff]  ;;  %825 = vst [vmem:[#allocation10 + $0x110] sm:$0xff] %v761_v0 }
 0x22b   :  { %816 = vst [vmem:[#allocation10 + $0x38] sm:$0xff] %v752_v1 }
 0x22c   :  { %v1054_v4 = vpack.c.bf16 %v1449_v3, %v1446_v2  ;;  %v926_v5 = vpop.f32.mrb[8].mxu1 }
 0x22d   :  { %v927_v6 = vpop.f32.mrb[9].mxu1 }
 0x22e   :  { %v928_v7 = vadd.f32 %v927_v6, %v926_v5  ;;  %v929_v8 = vpop.f32.mrb[10].mxu1  ;;  %1055 = vmatprep.subr.bf16.mxu0 %v1054_v4  ;;  %1083 = vmatprep.subr.bf16.mxu1 %v1054_v4  ;;  %v754_v5 = vld [vmem:[#allocation2 + $0x20] sm:$0xff] }
 0x22f   :  { %v930_v9 = vpop.f32.mrb[11].mxu1  ;;  %1057 = vmatpush3.bf16.xpose.msra.mxu0 %v1054_v4  ;;  %1091 = vmatpush3.bf16.xpose.msra.mxu1 %v1054_v4  ;;  %v763_v4 = vld [vmem:[#allocation2 + $0x68] sm:$0xff]  ;;  %v762_v6 = vld [vmem:[#allocation2 + $0x60] sm:$0xff]  ;;  %818 = vst [vmem:[#allocation10 + $0x68] sm:$0xff] %v754_v5 }
 0x230   :  { %v931_v10 = vadd.f32 %v930_v9, %v929_v8  ;;  %v1454_v11 = vadd.f32 %v928_v7, %v1438_v51  ;;  %827 = vst [vmem:[#allocation10 + $0x140] sm:$0xff] %v763_v4  ;;  %826 = vst [vmem:[#allocation10 + $0x128] sm:$0xff] %v762_v6  ;;  %v1484_v7 = vld [vmem:[#allocation2 + $0x38] sm:$0xff]  ;;  %v1488_v9 = vld [vmem:[#allocation2 + $0x30] sm:$0xff] }
 0x231   :  { %v1486_v8 = vld [vmem:[#allocation2 + $0x78] sm:$0xff]  ;;  %821 = vst [vmem:[#allocation10 + $0xb0] sm:$0xff] %v1484_v7  ;;  %820 = vst [vmem:[#allocation10 + $0x98] sm:$0xff] %v1488_v9 }
 0x232   :  { %v1457_v12 = vadd.f32 %v931_v10, %v1438_v51  ;;  %v1490_v10 = vld [vmem:[#allocation2 + $0x70] sm:$0xff]  ;;  %829 = vst [vmem:[#allocation10 + $0x170] sm:$0xff] %v1486_v8 }
 0x233   :  { %828 = vst [vmem:[#allocation10 + $0x158] sm:$0xff] %v1490_v10 }
 0x234   :  { %v1058_v13 = vpack.c.bf16 %v1457_v12, %v1454_v11  ;;  %v932_v14 = vpop.f32.mrb[12].mxu1 }
 0x235   :  { %v933_v15 = vpop.f32.mrb[13].mxu1 }
 0x236   :  { %v934_v16 = vadd.f32 %v933_v15, %v932_v14  ;;  %v935_v17 = vpop.f32.mrb[14].mxu1  ;;  %1059 = vmatprep.subr.bf16.mxu0 %v1058_v13  ;;  %1084 = vmatprep.subr.bf16.mxu1 %v1058_v13 }
 0x237   :  { %v936_v18 = vpop.f32.mrb[15].mxu1  ;;  %1061 = vmatpush3.bf16.xpose.msra.mxu0 %v1058_v13  ;;  %1092 = vmatpush3.bf16.xpose.msra.mxu1 %v1058_v13 }
 0x238   :  { %v937_v19 = vadd.f32 %v936_v18, %v935_v17  ;;  %v1462_v20 = vadd.f32 %v934_v16, %v1438_v51 }
 0x23a   :  { %v1465_v21 = vadd.f32 %v937_v19, %v1438_v51 }
 0x23c   :  { %v1062_v22 = vpack.c.bf16 %v1465_v21, %v1462_v20  ;;  %v938_v23 = vpop.f32.mrb[16].mxu1 }
 0x23d   :  { %v939_v24 = vpop.f32.mrb[17].mxu1 }
 0x23e   :  { %v940_v25 = vadd.f32 %v939_v24, %v938_v23  ;;  %v941_v26 = vpop.f32.mrb[18].mxu1  ;;  %1063 = vmatprep.subr.bf16.mxu0 %v1062_v22  ;;  %1085 = vmatprep.subr.bf16.mxu1 %v1062_v22 }
 0x23f   :  { %v942_v27 = vpop.f32.mrb[19].mxu1  ;;  %1065 = vmatpush3.bf16.xpose.msra.mxu0 %v1062_v22  ;;  %1093 = vmatpush3.bf16.xpose.msra.mxu1 %v1062_v22 }
 0x240   :  { %v575_v28 = vadd.f32 %v940_v25, %v1438_v51  ;;  %v943_v29 = vadd.f32 %v942_v27, %v941_v26 }
 0x242   :  { %v578_v30 = vadd.f32 %v943_v29, %v1438_v51  ;;  %1038 = vmatprep.mubr.f32.mxu1 %v575_v28 }
 0x244   :  { %v1066_v31 = vpack.c.bf16 %v578_v30, %v575_v28  ;;  %v944_v32 = vpop.f32.mrb[20].mxu1 }
 0x245   :  { %v945_v33 = vpop.f32.mrb[21].mxu1 }
 0x246   :  { %v946_v34 = vadd.f32 %v945_v33, %v944_v32  ;;  %v947_v35 = vpop.f32.mrb[22].mxu1  ;;  %1067 = vmatprep.subr.bf16.mxu0 %v1066_v31  ;;  %1086 = vmatprep.subr.bf16.mxu1 %v1066_v31 }
 0x247   :  { %v948_v36 = vpop.f32.mrb[23].mxu1  ;;  %1069 = vmatpush3.bf16.xpose.msra.mxu0 %v1066_v31  ;;  %1094 = vmatpush3.bf16.xpose.msra.mxu1 %v1066_v31 }
 0x248   :  { %v949_v37 = vadd.f32 %v948_v36, %v947_v35  ;;  %v583_v38 = vadd.f32 %v946_v34, %v1438_v51 }
 0x24a   :  { %v586_v39 = vadd.f32 %v949_v37, %v1438_v51 }
 0x24c   :  { %v1070_v40 = vpack.c.bf16 %v586_v39, %v583_v38  ;;  %v950_v41 = vpop.f32.mrb[24].mxu1 }
 0x24d   :  { %v951_v42 = vpop.f32.mrb[25].mxu1 }
 0x24e   :  { %v952_v43 = vadd.f32 %v951_v42, %v950_v41  ;;  %v953_v44 = vpop.f32.mrb[26].mxu1  ;;  %1071 = vmatprep.subr.bf16.mxu0 %v1070_v40  ;;  %1087 = vmatprep.subr.bf16.mxu1 %v1070_v40 }
 0x24f   :  { %v954_v45 = vpop.f32.mrb[27].mxu1  ;;  %1073 = vmatpush3.bf16.xpose.msra.mxu0 %v1070_v40  ;;  %1095 = vmatpush3.bf16.xpose.msra.mxu1 %v1070_v40 }
 0x250   :  { %v955_v46 = vadd.f32 %v954_v45, %v953_v44  ;;  %v591_v47 = vadd.f32 %v952_v43, %v1438_v51 }
 0x252   :  { %v594_v48 = vadd.f32 %v955_v46, %v1438_v51 }
 0x254   :  { %v1074_v49 = vpack.c.bf16 %v594_v48, %v591_v47  ;;  %v956_v50 = vpop.f32.mrb[28].mxu1 }
 0x255   :  { %v957_v52 = vpop.f32.mrb[29].mxu1 }
 0x256   :  { %v958_v62 = vadd.f32 %v957_v52, %v956_v50  ;;  %v959_v53 = vpop.f32.mrb[30].mxu1  ;;  %1075 = vmatprep.subr.bf16.mxu0 %v1074_v49  ;;  %1088 = vmatprep.subr.bf16.mxu1 %v1074_v49 }
 0x257   :  { %v960_v54 = vpop.f32.mrb[31].mxu1  ;;  %1077 = vmatpush3.bf16.xpose.msra.mxu0 %v1074_v49  ;;  %1096 = vmatpush3.bf16.xpose.msra.mxu1 %v1074_v49 }
 0x258   :  { %v961_v63 = vadd.f32 %v960_v54, %v959_v53  ;;  %v599_v55 = vadd.f32 %v958_v62, %v1438_v51 }
 0x25a   :  { %v602_v57 = vadd.f32 %v961_v63, %v1438_v51  ;;  %v751_v51 = vld [vmem:[#allocation2 + $0x8] sm:$0xff] }
 0x25b   :  { %815 = vst [vmem:[#allocation10 + $0x20] sm:$0xff] %v751_v51 }
 0x25c   :  { %v1078_v58 = vpack.c.bf16 %v602_v57, %v599_v55 }
 0x25e   :  { %1079 = vmatprep.subr.bf16.mxu0 %v1078_v58  ;;  %1089 = vmatprep.subr.bf16.mxu1 %v1078_v58 }
 0x25f   :  { %1081 = vmatpush3.bf16.xpose.msra.mxu0 %v1078_v58  ;;  %1097 = vmatpush3.bf16.xpose.msra.mxu1 %v1078_v58 }
 0x266   :  { %1027 = vmatmul.mubr.f32.vlgmr.msra.gmra.mrb[32].mxu0 %v1442_v56  ;;  %1039 = vmatmul.mubr.f32.vlgmr.msra.gmra.mrb[32].mxu1 %v578_v30  ;;  %v759_v56 = vld [vmem:[#allocation2 + $0x48] sm:$0xff] }
 0x267   :  { %1029 = vmatprep.mubr.f32.mxu0 %v1446_v2  ;;  %1041 = vmatprep.mubr.f32.mxu1 %v583_v38  ;;  %823 = vst [vmem:[#allocation10 + $0xe0] sm:$0xff] %v759_v56  ;;  %v760_v2 = vld [vmem:[#allocation2 + $0x50] sm:$0xff] }
 0x268   :  { %824 = vst [vmem:[#allocation10 + $0xf8] sm:$0xff] %v760_v2 }
 0x26a   :  { %1030 = vmatmul.mubr.f32.gmra.mrb[34].mxu0 %v1449_v3  ;;  %1042 = vmatmul.mubr.f32.gmra.mrb[34].mxu1 %v586_v39  ;;  %v755_v3 = vld [vmem:[#allocation2 + $0x28] sm:$0xff] }
 0x26b   :  { %1032 = vmatprep.mubr.f32.mxu0 %v1454_v11  ;;  %1044 = vmatprep.mubr.f32.mxu1 %v591_v47  ;;  %819 = vst [vmem:[#allocation10 + $0x80] sm:$0xff] %v755_v3  ;;  %v1278_v11 = vmov 0.0  }
 0x26c   :  { %830 = vst [vmem:[#allocation10 + $0x10] sm:$0xff] %v1278_v11  ;;  %831 = vst [vmem:[#allocation10 + $0x28] sm:$0xff] %v1278_v11 }
 0x26d   :  { %832 = vst [vmem:[#allocation10 + $0x40] sm:$0xff] %v1278_v11  ;;  %833 = vst [vmem:[#allocation10 + $0x58] sm:$0xff] %v1278_v11 }
 0x26e   :  { %1033 = vmatmul.mubr.f32.gmra.mrb[36].mxu0 %v1457_v12  ;;  %1045 = vmatmul.mubr.f32.gmra.mrb[36].mxu1 %v594_v48  ;;  %834 = vst [vmem:[#allocation10 + $0x70] sm:$0xff] %v1278_v11  ;;  %835 = vst [vmem:[#allocation10 + $0x88] sm:$0xff] %v1278_v11 }
 0x26f   :  { %1035 = vmatprep.mubr.f32.mxu0 %v1462_v20  ;;  %1047 = vmatprep.mubr.f32.mxu1 %v599_v55  ;;  %836 = vst [vmem:[#allocation10 + $0xa0] sm:$0xff] %v1278_v11  ;;  %837 = vst [vmem:[#allocation10 + $0xb8] sm:$0xff] %v1278_v11 }
 0x270   :  { %838 = vst [vmem:[#allocation10 + $0xd0] sm:$0xff] %v1278_v11  ;;  %839 = vst [vmem:[#allocation10 + $0xe8] sm:$0xff] %v1278_v11 }
 0x271   :  { %840 = vst [vmem:[#allocation10 + $0x100] sm:$0xff] %v1278_v11  ;;  %841 = vst [vmem:[#allocation10 + $0x118] sm:$0xff] %v1278_v11 }
 0x272   :  { %1036 = vmatmul.mubr.f32.gmra.mrb[38].mxu0 %v1465_v21  ;;  %1048 = vmatmul.mubr.f32.gmra.mrb[38].mxu1 %v602_v57  ;;  %842 = vst [vmem:[#allocation10 + $0x130] sm:$0xff] %v1278_v11  ;;  %843 = vst [vmem:[#allocation10 + $0x148] sm:$0xff] %v1278_v11 }
 0x273   :  { %844 = vst [vmem:[#allocation10 + $0x160] sm:$0xff] %v1278_v11  ;;  %845 = vst [vmem:[#allocation10 + $0x178] sm:$0xff] %v1278_v11 }
 0x339   :  { %v1028_v12 = vpop.f32.mrb[32].mxu0  ;;  %v1040_v13 = vpop.f32.mrb[32].mxu1 }
 0x33a   :  { %v767_v14 = vadd.f32 %v1028_v12, %v751_v51  ;;  %v775_v15 = vadd.f32 %v1040_v13, %v759_v56  ;;  %v671_v16 = vpop.f32.mrb[33].mxu0  ;;  %v711_v17 = vpop.f32.mrb[33].mxu1 }
 0x33b   :  { %v766_v18 = vadd.f32 %v750_v59, %v671_v16  ;;  %v774_v19 = vadd.f32 %v758_v60, %v711_v17 }
 0x33c   :  { %783 = vst [vmem:[#allocation10 + $0x18] sm:$0xff] %v767_v14  ;;  %791 = vst [vmem:[#allocation10 + $0xd8] sm:$0xff] %v775_v15 }
 0x33d   :  { %782 = vst [vmem:[#allocation10] sm:$0xff] %v766_v18  ;;  %790 = vst [vmem:[#allocation10 + $0xc0] sm:$0xff] %v774_v19  ;;  %v1031_v20 = vpop.f32.mrb[34].mxu0  ;;  %v1043_v21 = vpop.f32.mrb[34].mxu1 }
 0x33e   :  { %v769_v22 = vadd.f32 %v1031_v20, %v753_v61  ;;  %v777_v23 = vadd.f32 %v1043_v21, %v761_v0  ;;  %v681_v24 = vpop.f32.mrb[35].mxu0  ;;  %v721_v25 = vpop.f32.mrb[35].mxu1 }
 0x33f   :  { %v768_v26 = vadd.f32 %v752_v1, %v681_v24  ;;  %v776_v27 = vadd.f32 %v760_v2, %v721_v25 }
 0x340   :  { %785 = vst [vmem:[#allocation10 + $0x48] sm:$0xff] %v769_v22  ;;  %793 = vst [vmem:[#allocation10 + $0x108] sm:$0xff] %v777_v23 }
 0x341   :  { %784 = vst [vmem:[#allocation10 + $0x30] sm:$0xff] %v768_v26  ;;  %792 = vst [vmem:[#allocation10 + $0xf0] sm:$0xff] %v776_v27  ;;  %v1034_v28 = vpop.f32.mrb[36].mxu0  ;;  %v1046_v29 = vpop.f32.mrb[36].mxu1 }
 0x342   :  { %v771_v30 = vadd.f32 %v1034_v28, %v755_v3  ;;  %v779_v31 = vadd.f32 %v1046_v29, %v763_v4  ;;  %v691_v32 = vpop.f32.mrb[37].mxu0  ;;  %v731_v33 = vpop.f32.mrb[37].mxu1 }
 0x343   :  { %v770_v34 = vadd.f32 %v754_v5, %v691_v32  ;;  %v778_v35 = vadd.f32 %v762_v6, %v731_v33 }
 0x344   :  { %787 = vst [vmem:[#allocation10 + $0x78] sm:$0xff] %v771_v30  ;;  %795 = vst [vmem:[#allocation10 + $0x138] sm:$0xff] %v779_v31 }
 0x345   :  { %786 = vst [vmem:[#allocation10 + $0x60] sm:$0xff] %v770_v34  ;;  %794 = vst [vmem:[#allocation10 + $0x120] sm:$0xff] %v778_v35  ;;  %v1037_v36 = vpop.f32.mrb[38].mxu0  ;;  %v1049_v37 = vpop.f32.mrb[38].mxu1 }
 0x346   :  { %v773_v38 = vadd.f32 %v1037_v36, %v1484_v7  ;;  %v781_v39 = vadd.f32 %v1049_v37, %v1486_v8  ;;  %v701_v40 = vpop.f32.mrb[39].mxu0  ;;  %v741_v41 = vpop.f32.mrb[39].mxu1 }
 0x347   :  { %v772_v42 = vadd.f32 %v1488_v9, %v701_v40  ;;  %v780_v43 = vadd.f32 %v1490_v10, %v741_v41 }
 0x348   :  { %789 = vst [vmem:[#allocation10 + $0xa8] sm:$0xff] %v773_v38  ;;  %797 = vst [vmem:[#allocation10 + $0x168] sm:$0xff] %v781_v39 }
 0x349   :  { %788 = vst [vmem:[#allocation10 + $0x90] sm:$0xff] %v772_v42  ;;  %796 = vst [vmem:[#allocation10 + $0x150] sm:$0xff] %v780_v43 }
 0x34a   :  { %1250 = shalt.err (!%p1247_p8)
}
 0x34b   :  { %s1251_s28 = scalar_lea.hbm %s1518_s6, 6144 }
 0x34c   :  { %p1252_p9 = scmp.ne.s32.totalorder %s1518_s6, %s1251_s28  ;;  %p1255_p10 = scmp.lt.u32.totalorder %s1251_s28, %s1518_s6 }
 0x34e   :  { %p1257_p11 = pnand %p1255_p10, %p1252_p9 }
 0x350   :  { %1260 = shalt.err (!%p1257_p11)
}
 0x351   :  { %s1280_s11 = smov 384   ;;  %s1281_s0 = smov 24  }
 0x352   :  { %857 = dma.vmem_to_hbm [thread:$0]  %s852_s23, 6144, %s1518_s6, [#allocation4], %s1280_s11, %s1280_s11, %s1281_s0  }
 0x353   :  { %1267 = dma.done.wait [#allocation4], 6144  }
 0x354   :  { %1268 = vsyncadd [#allocation4], 4294961152 }
 0x355   :  { %861 = vsyncpa [#allocation3], 1 }
 0x356   :  { %862 = vsyncpa [#allocation6], 1 }
 0x357   :  { %863 = vsyncpa [#allocation9], 1 }
 0x358   :  { %864 = vsyncpa [#allocation4], 1 }

</bundles_post_ra>
